<compile_context>
chip_gen: v6e
topology: v6e:2x2x1
jax: 0.10.0
libtpu: 0.0.40
codegen_flags: <defaults>
</compile_context>

<pallas_src>
import functools

import jax
import jax.numpy as jnp
import numpy as np
from jax import lax
from jax.experimental import pallas as pl
from jax.experimental.pallas import tpu as pltpu

EPS = 1e-8   # nn.CosineSimilarity default eps
_K = 3       # kernel_size of the module (asserted in the wrapper)


def _round_up(x, m):
    return ((x + m - 1) // m) * m


def _split_points(c, k_taps):
    """Static row split points reproducing the reference quirk.

    Unfold row r = c*K + k reads similarity block r // C.  For each tap k the
    block index is a non-decreasing function of c, so it is fully described by
    two static thresholds (hi0, hi1): rows < hi0 -> sim_l, rows < hi1 -> sim_c,
    remaining rows -> sim_r.
    """
    pts = []
    for k in range(k_taps):
        blk = [(ci * k_taps + k) // c for ci in range(c)]
        hi0 = sum(1 for b in blk if b == 0)
        hi1 = sum(1 for b in blk if b <= 1)
        pts.append((hi0, hi1))
    return tuple(pts)


def _vmem_capacity_bytes():
    """Physical VMEM of the current chip; conservative fallback if unknown."""
    try:
        info = pltpu.get_tpu_info()
        cap = getattr(info, "vmem_capacity_bytes", None)
        if cap:
            return int(cap)
    except Exception:
        pass
    return 64 * 1024 * 1024   # v7x per-core size: safe lower bound everywhere


def _plan(B, C, E, O, T, f_isz, e_isz, d_isz, o_isz, t_tile):
    """Pick (Cp, Op, Tt, T_pad, NT, vmem_limit) from shapes + chip VMEM."""
    sub_in = 16 if d_isz == 2 else 8          # sublane multiple of the MXU operand
    sub_out = 16 if o_isz == 2 else 8         # sublane multiple of the output
    Cp = _round_up(C, sub_in)
    Op = _round_up(O, sub_out)

    cap = _vmem_capacity_bytes()
    vmem_limit = min(cap * 3 // 4, 100 * 1024 * 1024)

    def step_bytes(tt):
        # double-buffered pipelined blocks
        blocks = 2 * (Cp * tt * f_isz            # feature tile
                      + E * tt * e_isz           # embedding tile
                      + (Cp + E) * 2 * 4         # merged halo
                      + Op * tt * o_isz          # output tile
                      + Op * _K * Cp * d_isz)    # weight (constant index_map)
        scratch = _K * Cp * tt * d_isz           # fused MXU operand
        # rough estimate of live in-body values (taps, att, shifted emb, dot out)
        interm = tt * (3 * Cp * d_isz + 6 * E * 4 + 2 * Op * 4)
        return blocks + scratch + interm

    t_full = _round_up(T, 128)
    if t_tile is not None:
        Tt = min(max(128, (int(t_tile) // 128) * 128), t_full)
    else:
        Tt = min(2048, t_full)
        while Tt > 128 and step_bytes(Tt) > vmem_limit:
            Tt -= 128
        if B == 1:
            # Keep at least two parallel grid steps for v7x's two TensorCores.
            Tt = min(Tt, max(128, _round_up((T + 1) // 2, 128)))

    T_pad = _round_up(T, Tt)
    NT = T_pad // Tt
    vmem_limit = min(cap, max(vmem_limit, step_bytes(Tt) + (4 << 20)))
    return Cp, Op, Tt, T_pad, NT, int(vmem_limit)


# ---------------------------------------------------------------------------
# Pallas kernel: one (batch, time-tile) per grid step.
# ---------------------------------------------------------------------------
def _attention_conv1d_kernel(feat_ref, emb_ref, halo_ref, w_ref, out_ref, m_ref,
                             *, split_points, feat_dtype):
    # feat_ref : (1, Cp, Tt)           emb_ref : (1, E, Tt)
    # halo_ref : (1, 1, Cp+E, 2) f32   lane 0 = column left of tile, lane 1 = right
    # w_ref    : (Op, K*Cp)            out_ref : (1, Op, Tt)
    # m_ref    : (K*Cp, Tt) VMEM scratch holding the fused contraction operand.
    cp, tt = feat_ref.shape[1], feat_ref.shape[2]

    feat = feat_ref[0].astype(feat_dtype)            # (Cp, Tt) bf16 or f32
    emb = emb_ref[0].astype(jnp.float32)             # (E, Tt)  cosine math stays f32
    halo = halo_ref[0, 0]                            # (Cp+E, 2) f32
    fhalo = halo[:cp].astype(feat_dtype)             # (Cp, 2)
    ehalo = halo[cp:]                                 # (E, 2)

    # One small iota per axis, built once and reused everywhere.
    t_idx = lax.broadcasted_iota(jnp.int32, (1, tt), 1)       # lane index
    row_idx = lax.broadcasted_iota(jnp.int32, (cp, 1), 0)     # sublane index
    is_first = t_idx == 0
    is_last = t_idx == tt - 1

    def shift_l(x, halo_col):   # y[:, t] = x[:, t-1]; column 0 comes from the halo
        return jnp.where(is_first, halo_col, pltpu.roll(x, shift=1, axis=1))

    def shift_r(x, halo_col):   # y[:, t] = x[:, t+1]; last column comes from the halo
        return jnp.where(is_last, halo_col, pltpu.roll(x, shift=tt - 1, axis=1))

    # ---- cosine similarities over the embedding channel axis (f32) --------
    # PyTorch formulation: dot / sqrt(clamp(|a|^2 * |b|^2, eps^2)); one fused
    # rsqrt per side tap, exact 1.0 for the center tap.
    n2 = jnp.sum(emb * emb, axis=0, keepdims=True)            # (1, Tt)

    emb_l = shift_l(emb, ehalo[:, 0:1])
    sim_l = jnp.sum(emb * emb_l, axis=0, keepdims=True) * lax.rsqrt(
        jnp.maximum(n2 * jnp.sum(emb_l * emb_l, axis=0, keepdims=True), EPS * EPS))

    emb_r = shift_r(emb, ehalo[:, 1:2])
    sim_r = jnp.sum(emb * emb_r, axis=0, keepdims=True) * lax.rsqrt(
        jnp.maximum(n2 * jnp.sum(emb_r * emb_r, axis=0, keepdims=True), EPS * EPS))

    sim_c = jnp.where(n2 >= EPS, jnp.float32(1.0), n2 * jnp.float32(1.0 / EPS))

    # Feature-path element-wise math runs in feat_dtype (bf16 on v6e/v7x when
    # the inputs are bf16); only the three (1, Tt) sim rows are cast down.
    sims = (sim_l.astype(feat_dtype), sim_c.astype(feat_dtype),
            sim_r.astype(feat_dtype))

    # ---- fused contraction operand M (K*Cp, Tt), tap-major rows k*Cp + c ---
    # Attention rows are selected with *static* thresholds -> no runtime
    # integer divide; only one shifted feature slab is live at a time.
    for k in range(_K):
        hi0, hi1 = split_points[k]
        att_k = jnp.where(row_idx < hi0, sims[0],
                          jnp.where(row_idx < hi1, sims[1], sims[2]))   # (Cp, Tt)
        if k == 0:
            tap = shift_l(feat, fhalo[:, 0:1])
        elif k == 1:
            tap = feat
        else:
            tap = shift_r(feat, fhalo[:, 1:2])
        m_ref[pl.ds(k * cp, cp), :] = (tap * att_k).astype(m_ref.dtype)

    # ---- one MXU dot: (Op, K*Cp) @ (K*Cp, Tt) ------------------------------
    out = jnp.dot(w_ref[...], m_ref[...], preferred_element_type=jnp.float32)
    out_ref[0] = out.astype(out_ref.dtype)


# ---------------------------------------------------------------------------
# Wrapper
# ---------------------------------------------------------------------------
@functools.partial(jax.jit, static_argnames=("t_tile",))
def attention_conv1d(feature, embedding, weight, *, t_tile=None):
    """feature (B, C, T), embedding (B, E, T), weight (O, C, K=3) -> (B, O, T).

    t_tile=None picks the largest lane-dense time tile that fits the chip's
    VMEM budget (generation aware); pass an explicit multiple of 128 to force.
    """
    B, C, T = feature.shape
    E = embedding.shape[1]
    O, Cw, K = weight.shape
    assert Cw == C and K == _K, "AttentionConv1d semantics require kernel_size == 3"

    out_dtype = feature.dtype
    dot_dtype = (jnp.bfloat16
                 if (feature.dtype == jnp.bfloat16 and weight.dtype == jnp.bfloat16)
                 else jnp.float32)

    Cp, Op, Tt, T_pad, NT, vmem_limit = _plan(
        B, C, E, O, T,
        jnp.dtype(feature.dtype).itemsize, jnp.dtype(embedding.dtype).itemsize,
        jnp.dtype(dot_dtype).itemsize, jnp.dtype(out_dtype).itemsize, t_tile)

    # ---- wrapper-side layout plumbing (cheap XLA ops) ----------------------
    f = feature
    if Cp != C or T_pad != T:
        f = jnp.pad(f, ((0, 0), (0, Cp - C), (0, T_pad - T)))
    e = embedding
    if T_pad != T:
        e = jnp.pad(e, ((0, 0), (0, 0), (0, T_pad - T)))

    # Merged per-tile halo columns (f32): lane 0 = column just left of the
    # tile, lane 1 = column just right of it (zeros at the sequence ends).
    # One (Cp+E, 2) side input per grid step keeps every tile independent.
    def tile_halo(x):
        bx, ch, _ = x.shape
        xf = x.astype(jnp.float32)
        zero = jnp.zeros((bx, ch, 1), jnp.float32)
        left = jnp.concatenate([zero, xf[:, :, Tt - 1::Tt][:, :, :NT - 1]], axis=2)
        right = jnp.concatenate([xf[:, :, Tt::Tt][:, :, :NT - 1], zero], axis=2)
        halo = jnp.stack([left, right], axis=-1)              # (B, ch, NT, 2)
        return jnp.transpose(halo, (0, 2, 1, 3))              # (B, NT, ch, 2)

    halo = jnp.concatenate([tile_halo(f), tile_halo(e)], axis=2)   # (B, NT, Cp+E, 2)

    # Weight pre-flattened to (Op, K*Cp); contraction rows ordered k*Cp + c to
    # match the kernel's M layout.  Padded channels / outputs carry zeros.
    w_t = jnp.transpose(weight, (0, 2, 1))                    # (O, K, C)
    w_t = jnp.pad(w_t, ((0, Op - O), (0, 0), (0, Cp - C)))
    w_flat = w_t.reshape(Op, K * Cp).astype(dot_dtype)

    kernel = functools.partial(
        _attention_conv1d_kernel,
        split_points=_split_points(C, K),
        feat_dtype=dot_dtype,
    )

    out = pl.pallas_call(
        kernel,
        out_shape=jax.ShapeDtypeStruct((B, Op, T_pad), out_dtype),
        grid_spec=pltpu.PrefetchScalarGridSpec(
            num_scalar_prefetch=0,
            grid=(B, NT),
            in_specs=[
                pl.BlockSpec((1, Cp, Tt), lambda b, j: (b, 0, j)),
                pl.BlockSpec((1, E, Tt), lambda b, j: (b, 0, j)),
                pl.BlockSpec((1, 1, Cp + E, 2), lambda b, j: (b, j, 0, 0)),
                # NOTE: the constant-index weight block is still double-buffered
                # by the pipeliner; footprint is accounted for in _plan.
                pl.BlockSpec((Op, K * Cp), lambda b, j: (0, 0)),
            ],
            out_specs=pl.BlockSpec((1, Op, Tt), lambda b, j: (b, 0, j)),
            scratch_shapes=[pltpu.VMEM((K * Cp, Tt), dot_dtype)],
        ),
        compiler_params=pltpu.CompilerParams(
            # Every (batch, time-tile) step is independent -> shards across
            # v7x's two TensorCores; a no-op on v5e/v6e.
            dimension_semantics=("parallel", "parallel"),
            vmem_limit_bytes=vmem_limit,
        ),
    )(f, e, halo, w_flat)

    if Op != O or T_pad != T:
        out = out[:, :O, :T]
    return out


# ---------------------------------------------------------------------------
# Pure-JAX reference (mirrors the PyTorch forward, f32 math)
# ---------------------------------------------------------------------------
def attention_conv1d_ref(feature, embedding, weight):
    B, C, T = feature.shape
    O, _, K = weight.shape
    feat = feature.astype(jnp.float32)
    emb = embedding.astype(jnp.float32)
    w = weight.astype(jnp.float32)

    emb_l = jnp.concatenate([jnp.zeros_like(emb[:, :, :1]), emb[:, :, :-1]], axis=2)
    emb_r = jnp.concatenate([emb[:, :, 1:], jnp.zeros_like(emb[:, :, :1])], axis=2)

    def cos(a, b):
        num = jnp.sum(a * b, axis=1)
        den = jnp.sqrt(jnp.maximum(jnp.sum(a * a, axis=1) * jnp.sum(b * b, axis=1),
                                   EPS * EPS))
        return num / den

    sims = jnp.stack([cos(emb, emb_l), cos(emb, emb), cos(emb, emb_r)], axis=1)  # (B,3,T)

    feat_pad = jnp.pad(feat, ((0, 0), (0, 0), (1, 1)))
    inp_unf = jnp.stack([feat_pad[:, :, k:k + T] for k in range(K)], axis=2)
    inp_unf = inp_unf.reshape(B, C * K, T)

    att = sims[:, jnp.arange(C * K) // C, :]          # reference quirk: block = row // C
    w_flat = w.reshape(O, C * K)
    return jnp.einsum('brt,or->bot', inp_unf * att, w_flat)


if __name__ == "__main__":
    def run_case(key, B, C, E, O, T, dtype, t_tile=None, atol=1e-2, rtol=1e-2):
        k1, k2, k3 = jax.random.split(key, 3)
        feature = jax.random.normal(k1, (B, C, T), dtype=jnp.float32).astype(dtype)
        embedding = jax.random.normal(k2, (B, E, T), dtype=jnp.float32).astype(dtype)
        weight = (jax.random.normal(k3, (O, C, _K), dtype=jnp.float32) * 0.1).astype(dtype)

        out = attention_conv1d(feature, embedding, weight, t_tile=t_tile)
        out = jax.block_until_ready(out)

        ref = attention_conv1d_ref(feature, embedding, weight)
        np.testing.assert_allclose(np.asarray(out, dtype=np.float32),
                                   np.asarray(ref), rtol=rtol, atol=atol)

    root = jax.random.PRNGKey(0)
    ka, kb, kc = jax.random.split(root, 3)
    # multi-tile path forced (T not a multiple of 128, C not a sublane multiple)
    run_case(ka, B=2, C=4, E=4, O=8, T=300, dtype=jnp.float32, t_tile=128)
    # auto tiling with B == 1 -> time axis split so the grid has 2 parallel steps
    run_case(kb, B=1, C=8, E=6, O=16, T=256, dtype=jnp.float32)
    # bf16 feature path: odd C/O exercise channel/output padding, T padding
    run_case(kc, B=2, C=5, E=4, O=6, T=200, dtype=jnp.bfloat16, atol=1e-1, rtol=1e-1)

    print("KERNEL_OK")
</pallas_src>

<mosaic_0001>
module attributes {stable_mosaic.version = 11 : i64} {
  func.func @_attention_conv1d_kernel(%arg0: i32, %arg1: i32, %arg2: memref<1x8x128xf32, #tpu.memory_space<vmem>>, %arg3: memref<1x4x128xf32, #tpu.memory_space<vmem>>, %arg4: memref<1x1x12x2xf32, #tpu.memory_space<vmem>>, %arg5: memref<8x24xf32, #tpu.memory_space<vmem>>, %arg6: memref<1x8x128xf32, #tpu.memory_space<vmem>>, %arg7: memref<24x128xf32, #tpu.memory_space<vmem>>) attributes {dimension_semantics = [#tpu.dimension_semantics<parallel>, #tpu.dimension_semantics<parallel>], iteration_bounds = array<i64: 2, 3>, scalar_prefetch = 0 : i64, scratch_operands = 1 : i64, tpu.core_type = #tpu.core_type<tc>, window_params = [{transform_indices = @transform_0, window_bounds = array<i64: 1, 8, 128>}, {transform_indices = @transform_1, window_bounds = array<i64: 1, 4, 128>}, {transform_indices = @transform_2, window_bounds = array<i64: 1, 1, 12, 2>}, {pipeline_mode = #tpu.pipeline_mode<synchronous>, transform_indices = @transform_3, window_bounds = array<i64: 8, 24>}, {transform_indices = @transform_4, window_bounds = array<i64: 1, 8, 128>}]} {
    %c0 = arith.constant 0 : index
    %c0_0 = arith.constant 0 : index
    %c0_1 = arith.constant 0 : index
    %0 = vector.load %arg2[%c0, %c0_0, %c0_1] : memref<1x8x128xf32, #tpu.memory_space<vmem>>, vector<1x8x128xf32>
    %1 = vector.shape_cast %0 : vector<1x8x128xf32> to vector<8x128xf32>
    %c0_2 = arith.constant 0 : index
    %c0_3 = arith.constant 0 : index
    %c0_4 = arith.constant 0 : index
    %2 = vector.load %arg3[%c0_2, %c0_3, %c0_4] : memref<1x4x128xf32, #tpu.memory_space<vmem>>, vector<1x4x128xf32>
    %3 = vector.shape_cast %2 : vector<1x4x128xf32> to vector<4x128xf32>
    %c0_5 = arith.constant 0 : index
    %c0_6 = arith.constant 0 : index
    %c0_7 = arith.constant 0 : index
    %c0_8 = arith.constant 0 : index
    %4 = vector.load %arg4[%c0_5, %c0_6, %c0_7, %c0_8] : memref<1x1x12x2xf32, #tpu.memory_space<vmem>>, vector<1x1x12x2xf32>
    %5 = vector.shape_cast %4 : vector<1x1x12x2xf32> to vector<12x2xf32>
    %6 = vector.extract_strided_slice %5 {offsets = [0, 0], sizes = [8, 2], strides = [1, 1]} : vector<12x2xf32> to vector<8x2xf32>
    %7 = vector.extract_strided_slice %5 {offsets = [8, 0], sizes = [4, 2], strides = [1, 1]} : vector<12x2xf32> to vector<4x2xf32>
    %8 = tpu.iota {dimensions = array<i32: 1>} : vector<1x128xi32>
    %9 = tpu.iota {dimensions = array<i32: 0>} : vector<8x1xi32>
    %c0_i32 = arith.constant 0 : i32
    %10 = vector.broadcast %c0_i32 : i32 to vector<1x128xi32>
    %11 = arith.cmpi eq, %8, %10 : vector<1x128xi32>
    %c127_i32 = arith.constant 127 : i32
    %12 = vector.broadcast %c127_i32 : i32 to vector<1x128xi32>
    %13 = arith.cmpi eq, %8, %12 : vector<1x128xi32>
    %14 = arith.mulf %3, %3 : vector<4x128xf32>
    %cst = arith.constant dense<0.000000e+00> : vector<128xf32>
    %15 = vector.multi_reduction <add>, %14, %cst [0] : vector<4x128xf32> to vector<128xf32>
    %16 = vector.shape_cast %15 : vector<128xf32> to vector<1x128xf32>
    %17 = vector.extract_strided_slice %7 {offsets = [0, 0], sizes = [4, 1], strides = [1, 1]} : vector<4x2xf32> to vector<4x1xf32>
    %c1_i32 = arith.constant 1 : i32
    %18 = tpu.dynamic_rotate %3 by %c1_i32 dim 1 : vector<4x128xf32>, i32 -> vector<4x128xf32>
    %19 = vector.shape_cast %11 : vector<1x128xi1> to vector<1x128xi1>
    %20 = vector.broadcast %19 : vector<1x128xi1> to vector<4x128xi1>
    %21 = vector.shape_cast %17 : vector<4x1xf32> to vector<4x1xf32>
    %22 = vector.broadcast %21 : vector<4x1xf32> to vector<4x128xf32>
    %23 = arith.select %20, %22, %18 : vector<4x128xi1>, vector<4x128xf32>
    %24 = arith.mulf %3, %23 : vector<4x128xf32>
    %cst_9 = arith.constant dense<0.000000e+00> : vector<128xf32>
    %25 = vector.multi_reduction <add>, %24, %cst_9 [0] : vector<4x128xf32> to vector<128xf32>
    %26 = vector.shape_cast %25 : vector<128xf32> to vector<1x128xf32>
    %27 = arith.mulf %23, %23 : vector<4x128xf32>
    %cst_10 = arith.constant dense<0.000000e+00> : vector<128xf32>
    %28 = vector.multi_reduction <add>, %27, %cst_10 [0] : vector<4x128xf32> to vector<128xf32>
    %29 = vector.shape_cast %28 : vector<128xf32> to vector<1x128xf32>
    %30 = arith.mulf %16, %29 : vector<1x128xf32>
    %cst_11 = arith.constant 1.000000e-16 : f32
    %31 = vector.broadcast %cst_11 : f32 to vector<1x128xf32>
    %32 = arith.maximumf %30, %31 : vector<1x128xf32>
    %33 = math.rsqrt %32 : vector<1x128xf32>
    %34 = arith.mulf %26, %33 : vector<1x128xf32>
    %35 = vector.extract_strided_slice %7 {offsets = [0, 1], sizes = [4, 1], strides = [1, 1]} : vector<4x2xf32> to vector<4x1xf32>
    %c127_i32_12 = arith.constant 127 : i32
    %36 = tpu.dynamic_rotate %3 by %c127_i32_12 dim 1 : vector<4x128xf32>, i32 -> vector<4x128xf32>
    %37 = vector.shape_cast %13 : vector<1x128xi1> to vector<1x128xi1>
    %38 = vector.broadcast %37 : vector<1x128xi1> to vector<4x128xi1>
    %39 = vector.shape_cast %35 : vector<4x1xf32> to vector<4x1xf32>
    %40 = vector.broadcast %39 : vector<4x1xf32> to vector<4x128xf32>
    %41 = arith.select %38, %40, %36 : vector<4x128xi1>, vector<4x128xf32>
    %42 = arith.mulf %3, %41 : vector<4x128xf32>
    %cst_13 = arith.constant dense<0.000000e+00> : vector<128xf32>
    %43 = vector.multi_reduction <add>, %42, %cst_13 [0] : vector<4x128xf32> to vector<128xf32>
    %44 = vector.shape_cast %43 : vector<128xf32> to vector<1x128xf32>
    %45 = arith.mulf %41, %41 : vector<4x128xf32>
    %cst_14 = arith.constant dense<0.000000e+00> : vector<128xf32>
    %46 = vector.multi_reduction <add>, %45, %cst_14 [0] : vector<4x128xf32> to vector<128xf32>
    %47 = vector.shape_cast %46 : vector<128xf32> to vector<1x128xf32>
    %48 = arith.mulf %16, %47 : vector<1x128xf32>
    %cst_15 = arith.constant 1.000000e-16 : f32
    %49 = vector.broadcast %cst_15 : f32 to vector<1x128xf32>
    %50 = arith.maximumf %48, %49 : vector<1x128xf32>
    %51 = math.rsqrt %50 : vector<1x128xf32>
    %52 = arith.mulf %44, %51 : vector<1x128xf32>
    %cst_16 = arith.constant 9.99999993E-9 : f32
    %53 = vector.broadcast %cst_16 : f32 to vector<1x128xf32>
    %54 = arith.cmpf oge, %16, %53 : vector<1x128xf32>
    %cst_17 = arith.constant 1.000000e+08 : f32
    %55 = vector.broadcast %cst_17 : f32 to vector<1x128xf32>
    %56 = arith.mulf %16, %55 : vector<1x128xf32>
    %cst_18 = arith.constant 1.000000e+00 : f32
    %57 = vector.broadcast %cst_18 : f32 to vector<1x128xf32>
    %58 = arith.select %54, %57, %56 : vector<1x128xi1>, vector<1x128xf32>
    %c2_i32 = arith.constant 2 : i32
    %59 = vector.broadcast %c2_i32 : i32 to vector<8x1xi32>
    %60 = arith.cmpi slt, %9, %59 : vector<8x1xi32>
    %c3_i32 = arith.constant 3 : i32
    %61 = vector.broadcast %c3_i32 : i32 to vector<8x1xi32>
    %62 = arith.cmpi slt, %9, %61 : vector<8x1xi32>
    %63 = vector.shape_cast %62 : vector<8x1xi1> to vector<8x1xi1>
    %64 = vector.broadcast %63 : vector<8x1xi1> to vector<8x128xi1>
    %65 = vector.shape_cast %58 : vector<1x128xf32> to vector<1x128xf32>
    %66 = vector.broadcast %65 : vector<1x128xf32> to vector<8x128xf32>
    %67 = vector.shape_cast %52 : vector<1x128xf32> to vector<1x128xf32>
    %68 = vector.broadcast %67 : vector<1x128xf32> to vector<8x128xf32>
    %69 = arith.select %64, %66, %68 : vector<8x128xi1>, vector<8x128xf32>
    %70 = vector.shape_cast %60 : vector<8x1xi1> to vector<8x1xi1>
    %71 = vector.broadcast %70 : vector<8x1xi1> to vector<8x128xi1>
    %72 = vector.shape_cast %34 : vector<1x128xf32> to vector<1x128xf32>
    %73 = vector.broadcast %72 : vector<1x128xf32> to vector<8x128xf32>
    %74 = arith.select %71, %73, %69 : vector<8x128xi1>, vector<8x128xf32>
    %75 = vector.extract_strided_slice %6 {offsets = [0, 0], sizes = [8, 1], strides = [1, 1]} : vector<8x2xf32> to vector<8x1xf32>
    %c1_i32_19 = arith.constant 1 : i32
    %76 = tpu.dynamic_rotate %1 by %c1_i32_19 dim 1 : vector<8x128xf32>, i32 -> vector<8x128xf32>
    %77 = vector.shape_cast %11 : vector<1x128xi1> to vector<1x128xi1>
    %78 = vector.broadcast %77 : vector<1x128xi1> to vector<8x128xi1>
    %79 = vector.shape_cast %75 : vector<8x1xf32> to vector<8x1xf32>
    %80 = vector.broadcast %79 : vector<8x1xf32> to vector<8x128xf32>
    %81 = arith.select %78, %80, %76 : vector<8x128xi1>, vector<8x128xf32>
    %82 = arith.mulf %81, %74 : vector<8x128xf32>
    %c0_20 = arith.constant 0 : index
    %c0_21 = arith.constant 0 : index
    %83 = vector.load %arg7[%c0_20, %c0_21] : memref<24x128xf32, #tpu.memory_space<vmem>>, vector<8x128xf32>
    tpu.vector_store %arg7[%c0_20, %c0_21], %82 {strides = array<i32>} : memref<24x128xf32, #tpu.memory_space<vmem>>, vector<8x128xf32>,
    %c1_i32_22 = arith.constant 1 : i32
    %84 = vector.broadcast %c1_i32_22 : i32 to vector<8x1xi32>
    %85 = arith.cmpi slt, %9, %84 : vector<8x1xi32>
    %c3_i32_23 = arith.constant 3 : i32
    %86 = vector.broadcast %c3_i32_23 : i32 to vector<8x1xi32>
    %87 = arith.cmpi slt, %9, %86 : vector<8x1xi32>
    %88 = vector.shape_cast %87 : vector<8x1xi1> to vector<8x1xi1>
    %89 = vector.broadcast %88 : vector<8x1xi1> to vector<8x128xi1>
    %90 = vector.shape_cast %58 : vector<1x128xf32> to vector<1x128xf32>
    %91 = vector.broadcast %90 : vector<1x128xf32> to vector<8x128xf32>
    %92 = vector.shape_cast %52 : vector<1x128xf32> to vector<1x128xf32>
    %93 = vector.broadcast %92 : vector<1x128xf32> to vector<8x128xf32>
    %94 = arith.select %89, %91, %93 : vector<8x128xi1>, vector<8x128xf32>
    %95 = vector.shape_cast %85 : vector<8x1xi1> to vector<8x1xi1>
    %96 = vector.broadcast %95 : vector<8x1xi1> to vector<8x128xi1>
    %97 = vector.shape_cast %34 : vector<1x128xf32> to vector<1x128xf32>
    %98 = vector.broadcast %97 : vector<1x128xf32> to vector<8x128xf32>
    %99 = arith.select %96, %98, %94 : vector<8x128xi1>, vector<8x128xf32>
    %100 = arith.mulf %1, %99 : vector<8x128xf32>
    %c8 = arith.constant 8 : index
    %c0_24 = arith.constant 0 : index
    %101 = vector.load %arg7[%c8, %c0_24] : memref<24x128xf32, #tpu.memory_space<vmem>>, vector<8x128xf32>
    tpu.vector_store %arg7[%c8, %c0_24], %100 {strides = array<i32>} : memref<24x128xf32, #tpu.memory_space<vmem>>, vector<8x128xf32>,
    %c1_i32_25 = arith.constant 1 : i32
    %102 = vector.broadcast %c1_i32_25 : i32 to vector<8x1xi32>
    %103 = arith.cmpi slt, %9, %102 : vector<8x1xi32>
    %c2_i32_26 = arith.constant 2 : i32
    %104 = vector.broadcast %c2_i32_26 : i32 to vector<8x1xi32>
    %105 = arith.cmpi slt, %9, %104 : vector<8x1xi32>
    %106 = vector.shape_cast %105 : vector<8x1xi1> to vector<8x1xi1>
    %107 = vector.broadcast %106 : vector<8x1xi1> to vector<8x128xi1>
    %108 = vector.shape_cast %58 : vector<1x128xf32> to vector<1x128xf32>
    %109 = vector.broadcast %108 : vector<1x128xf32> to vector<8x128xf32>
    %110 = vector.shape_cast %52 : vector<1x128xf32> to vector<1x128xf32>
    %111 = vector.broadcast %110 : vector<1x128xf32> to vector<8x128xf32>
    %112 = arith.select %107, %109, %111 : vector<8x128xi1>, vector<8x128xf32>
    %113 = vector.shape_cast %103 : vector<8x1xi1> to vector<8x1xi1>
    %114 = vector.broadcast %113 : vector<8x1xi1> to vector<8x128xi1>
    %115 = vector.shape_cast %34 : vector<1x128xf32> to vector<1x128xf32>
    %116 = vector.broadcast %115 : vector<1x128xf32> to vector<8x128xf32>
    %117 = arith.select %114, %116, %112 : vector<8x128xi1>, vector<8x128xf32>
    %118 = vector.extract_strided_slice %6 {offsets = [0, 1], sizes = [8, 1], strides = [1, 1]} : vector<8x2xf32> to vector<8x1xf32>
    %c127_i32_27 = arith.constant 127 : i32
    %119 = tpu.dynamic_rotate %1 by %c127_i32_27 dim 1 : vector<8x128xf32>, i32 -> vector<8x128xf32>
    %120 = vector.shape_cast %13 : vector<1x128xi1> to vector<1x128xi1>
    %121 = vector.broadcast %120 : vector<1x128xi1> to vector<8x128xi1>
    %122 = vector.shape_cast %118 : vector<8x1xf32> to vector<8x1xf32>
    %123 = vector.broadcast %122 : vector<8x1xf32> to vector<8x128xf32>
    %124 = arith.select %121, %123, %119 : vector<8x128xi1>, vector<8x128xf32>
    %125 = arith.mulf %124, %117 : vector<8x128xf32>
    %c16 = arith.constant 16 : index
    %c0_28 = arith.constant 0 : index
    %126 = vector.load %arg7[%c16, %c0_28] : memref<24x128xf32, #tpu.memory_space<vmem>>, vector<8x128xf32>
    tpu.vector_store %arg7[%c16, %c0_28], %125 {strides = array<i32>} : memref<24x128xf32, #tpu.memory_space<vmem>>, vector<8x128xf32>,
    %c0_29 = arith.constant 0 : index
    %c0_30 = arith.constant 0 : index
    %127 = vector.load %arg5[%c0_29, %c0_30] : memref<8x24xf32, #tpu.memory_space<vmem>>, vector<8x24xf32>
    %c0_31 = arith.constant 0 : index
    %c0_32 = arith.constant 0 : index
    %128 = vector.load %arg7[%c0_31, %c0_32] : memref<24x128xf32, #tpu.memory_space<vmem>>, vector<24x128xf32>
    %cst_33 = arith.constant dense<0.000000e+00> : vector<8x128xf32>
    %129 = tpu.matmul %127, %128, %cst_33 {dimension_numbers = #tpu.dot_dimension_numbers<[1], [0], [0], [1], [0, 0, 1, 1], [], []>} : vector<8x24xf32>, vector<24x128xf32>, vector<8x128xf32> -> vector<8x128xf32>
    %c0_34 = arith.constant 0 : index
    %c0_35 = arith.constant 0 : index
    %c0_36 = arith.constant 0 : index
    %130 = vector.load %arg6[%c0_34, %c0_35, %c0_36] : memref<1x8x128xf32, #tpu.memory_space<vmem>>, vector<1x8x128xf32>
    %131 = vector.shape_cast %130 : vector<1x8x128xf32> to vector<8x128xf32>
    %132 = vector.shape_cast %129 : vector<8x128xf32> to vector<1x8x128xf32>
    tpu.vector_store %arg6[%c0_34, %c0_35, %c0_36], %132 {strides = array<i32>} : memref<1x8x128xf32, #tpu.memory_space<vmem>>, vector<1x8x128xf32>,
    return
  }
  func.func @transform_0(%arg0: i32, %arg1: i32) -> (i32, i32, i32) {
    %c0_i32 = arith.constant 0 : i32
    %c0_i32_0 = arith.constant 0 : i32
    return %arg0, %c0_i32, %arg1 : i32, i32, i32
  }
  func.func @transform_1(%arg0: i32, %arg1: i32) -> (i32, i32, i32) {
    %c0_i32 = arith.constant 0 : i32
    %c0_i32_0 = arith.constant 0 : i32
    return %arg0, %c0_i32, %arg1 : i32, i32, i32
  }
  func.func @transform_2(%arg0: i32, %arg1: i32) -> (i32, i32, i32, i32) {
    %c0_i32 = arith.constant 0 : i32
    %c0_i32_0 = arith.constant 0 : i32
    %c0_i32_1 = arith.constant 0 : i32
    return %arg0, %arg1, %c0_i32, %c0_i32_0 : i32, i32, i32, i32
  }
  func.func @transform_3(%arg0: i32, %arg1: i32) -> (i32, i32) {
    %c0_i32 = arith.constant 0 : i32
    %c0_i32_0 = arith.constant 0 : i32
    %c0_i32_1 = arith.constant 0 : i32
    return %c0_i32, %c0_i32_0 : i32, i32
  }
  func.func @transform_4(%arg0: i32, %arg1: i32) -> (i32, i32, i32) {
    %c0_i32 = arith.constant 0 : i32
    %c0_i32_0 = arith.constant 0 : i32
    return %arg0, %c0_i32, %arg1 : i32, i32, i32
  }
}

</mosaic_0001>

<bundles_post_ra>
// kernel: attention_conv1d.1
= control target key start
LH: loop header
LB: loop body
LE: loop exit
PB: predicated region body
PF: predicated region fallthrough
CT: control target
= control target key end

     0   :  { %9 = vsyncpa [#allocation4], 0  ;;  %s1027_s0 = inlined_call_operand.vmem [shape: f32[2,8,384], index: 0, kind: input, shape index: {}]   ;;  %s1028_s1 = inlined_call_operand.vmem [shape: f32[2,4,384], index: 1, kind: input, shape index: {}]   ;;  %s1029_s2 = inlined_call_operand.vmem [shape: f32[2,3,12,2], index: 2, kind: input, shape index: {}]   ;;  %s1030_s3 = inlined_call_operand.vmem [shape: f32[8,24], index: 3, kind: input, shape index: {}]   ;;  %s1031_s4 = inlined_call_operand.hbm [shape: f32[2,8,384], index: 4, kind: output, shape index: {}]  }
   0x1   :  { %11 = vsyncpa [#allocation4 + $0x1], 0  ;;  %s856_s15 = smov 0   ;;  %s858_s16 = smov 0  }
   0x2   :  { %s860_s17 = smov 0   ;;  %s862_s18 = smov 0  }
   0x3   :  { %s864_s19 = smov 0   ;;  %s866_s20 = smov 0  }
   0x4   :  { %s868_s21 = smov 0   ;;  %s870_s22 = smov 0  }
   0x5 LB: > { %1035 = sst [smem:[#allocation6_spill]] %s818_s21  ;;  %s614_s23 = sadd.s32 4294967295, %s822_s22   ;;  %s822_s22 = sphi %s870_s22, %s17_s22   ;;  %s818_s21 = sphi %s868_s21, %s1042_s21   ;;  %s814_s20 = sphi %s866_s20, %s1047_s20   ;;  %s810_s19 = sphi %s864_s19, %s1040_s19   ;;  %s806_s18 = sphi %s862_s18, %s1046_s18   ;;  %s802_s17 = sphi %s860_s17, %s1045_s17   ;;  %s798_s16 = sphi %s858_s16, %s1044_s16   ;;  %s794_s15 = sphi %s856_s15, %s1043_s15  }
   0x6   : > { %s615_s24 = sadd.s32 4294967294, %s822_s22   ;;  %s26_s25 = sadd.s32 1, %s814_s20 }
   0x7   : > { %p27_p0 = scmp.ge.s32.totalorder %s26_s25, 3  ;;  %s29_s26 = sadd.s32 1, %s818_s21 }
   0x8   : > { %p153_p1 = scmp.ne.s32.totalorder %s802_s17, %s798_s16  ;;  %p154_p2 = scmp.eq.s32.totalorder %s614_s23, 5 }
   0x9   : > { %s1049_s25 = smov (%p27_p0, %s26_s25), 0  ;;  %s1051_s26 = smov (!%p27_p0, %s29_s26), %s818_s21 }
   0xa   : > { %1036 = sst [smem:[#allocation7_spill]] %s1049_s25  ;;  %s139_s27 = ssub.s32 %s814_s20, %s1049_s25 }
   0xb   : > { %p907_p3 = por %p154_p2, %p153_p1  ;;  %p31_p4 = scmp.ge.s32.totalorder %s1051_s26, 2 }
   0xc   : > { %p159_p5 = scmp.ne.s32.totalorder %s798_s16, %s794_s15  ;;  %p160_p6 = scmp.eq.s32.totalorder %s615_s24, 5 }
   0xd   : > { %p618_p7 = scmp.ge.s32.totalorder %s822_s22, 1  ;;  %s1053_s26 = smov (%p31_p4, %s1051_s26), 0 }
   0xe   : > { %1038 = sst [smem:[#allocation8_spill]] %s1053_s26  ;;  %p916_p8 = por %p160_p6, %p159_p5 }
   0xf   : > { %p215_p9 = scmp.lt.s32.totalorder %s822_s22, 7  ;;  %s138_s30 = ssub.s32 %s818_s21, %s1053_s26 }
  0x10   : > { %s143_s5 = sadd.s32 1, %s802_s17  ;;  %s140_s6 = sor.u32 %s139_s27, %s138_s30 }
  0x11   : > { %p216_p10 = pnand %p618_p7, %p215_p9  ;;  %p141_p11 = scmp.eq.s32.totalorder %s140_s6, 0 }
  0x12   : > { %p261_p12 = scmp.lt.s32.totalorder (!%p216_p10), %s810_s19, 1  ;;  %p263_p13 = scmp.lt.s32.totalorder (!%p216_p10), %s806_s18, 2 }
  0x13   : > { %s925_s7 = scalar_select %p141_p11, %s802_s17, %s143_s5  }
  0x14   : > { %219 = sbr.rel (%p216_p10) target bundleno = 413 (0x19d), region = 36  ;;  %s825_s21 = smov (!%p216_p10), 127  }
  0x15   : > { %s258_s26 = sand.u32 (!%p216_p10), 1, %s798_s16  }
  0x19   : > { %v824_v0 = vmov 1   ;;  %s262_s8 = scalar_select %p261_p12, %s810_s19, 1  ;;  %v826_v3 = vmov 0   ;;  %v828_v6 = vmov 0.0   ;;  %vm829_vm0 = vmmov 0  }
  0x1a   : > { %722 = vset.pattern.permute.xlu0 %v824_v0  ;;  %724 = vset.pattern.permute.xlu1 %v824_v0  ;;  %s264_s9 = scalar_select %p263_p13, %s806_s18, 2  ;;  %vm297_vm1 = vcmask 1043456   ;;  %v290_v8 = vlaneseq  ;;  %vm406_vm8 = vcmask 195584  }
  0x1b   : > { %s643_s10 = smul.u32 6, %s262_s8  ;;  %633 = vmatprep.subr.mxu0 %v828_v6  ;;  %639 = vmatprep.mubr.msk.f32.mxu0 %vm829_vm0, %v828_v6 }
  0x1c   : > { %s622_s11 = sshll.u32 %s264_s9, 1  ;;  %s642_s12 = smul.u32 3, %s262_s8  ;;  %v947_v11 = vand.u32 127, %v290_v8  ;;  %v293_v58 = vshrl.u32 %v290_v8, 7 }
  0x1d   : > { %s283_s13 = sadd.s32 %s643_s10, %s622_s11  ;;  %s827_s10 = smov 1  }
  0x1e   : > { %s623_s14 = sshll.u32 %s283_s13, 3  ;;  %s266_s23 = sadd.s32 %s642_s12, %s264_s9  ;;  %vm295_vm2 = vcmp.eq.s32.totalorder %v947_v11, 127  ;;  %vm294_vm3 = vcmp.eq.s32.totalorder %v947_v11, 0  ;;  %vm367_vm5 = vcmp.lt.s32.totalorder %v293_v58, 2  ;;  %vm368_vm6 = vcmp.lt.s32.totalorder %v293_v58, 3 }
  0x1f   : > { %s285_s30 = scalar_lea.vmem %s1029_s2, %s623_s14  ;;  %s621_s5 = sshll.u32 %s266_s23, 2  ;;  %vm385_vm7 = vcmp.lt.s32.totalorder %v293_v58, 1 }
  0x20   : > { %v289_v1 = vld [vmem:[%s285_s30 + $0x8] sm:$0xf]  ;;  %s276_s25 = scalar_lea.vmem %s1028_s1, %s621_s5  ;;  %s620_s8 = sshll.u32 %s266_s23, 3  ;;  %v288_v4 = vld [vmem:[%s285_s30] sm:$0xff] }
  0x21   : > { %340 = vperm.xlu0 %722, %v289_v1   ;;  %v287_v2 = vld [vmem:[%s276_s25] sm:$0xf]  ;;  %s268_s12 = scalar_lea.vmem %s1027_s0, %s620_s8  ;;  %s619_s13 = sshll.u32 %s258_s26, 3 }
  0x22   : > { %335 = vrot.lane.b32.xlu1 %v287_v2, %s825_s21  ;;  %v940_v5 = vld [vmem:[%s268_s12] sm:$0xff]  ;;  %v296_v7 = vmul.f32 %v287_v2, %v287_v2  ;;  %s644_s14 = smul.u32 3, %s810_s19  ;;  %s260_s24 = scalar_lea.vmem [#allocation3], %s619_s13 }
  0x23   : > { %s497_s27 = sshll.u32 %s260_s24, 4  ;;  %s972_s27 = int_to_ptr.vmem [resolvable:$true] %s497_s27 }
  0x24   : > { %v298_v9 = vsel %vm297_vm1, %v296_v7, 0.0  ;;  %s493_s23 = sadd.s32 %s806_s18, %s644_s14  ;;  %s730_s9 = scalar_lea.vmem %s972_s27, 128 }
  0x25   : > { %723 = vset.pattern.permute.xlu0 %v826_v3  ;;  %v299_v10 = vrot.slane %v298_v9, 4  ;;  %s626_s30 = sshll.u32 %s493_s23, 7  ;;  %p731_p0 = scmp.ne.s32.totalorder %s972_s27, %s730_s9 }
  0x26   : > { %311 = vperm.xlu0 %723, %v289_v1   ;;  %305 = vrot.lane.b32.xlu1 %v287_v2, %s827_s10  ;;  %s977_s8 = scalar_lea.hbm %s1031_s4, %s626_s30  ;;  %s830_s18 = smov [#allocation3]  }
  0x27   : > { %v300_v13 = vadd.f32 %v299_v10, %v298_v9  ;;  %p732_p1 = pnand %p731_p0, %p907_p3  ;;  %s734_s19 = sshll.u32 %s830_s18, 4  ;;  %s735_s19 = int_to_ptr.vmem [resolvable:$false] %s734_s19 }
  0x28   : > { %s736_s11 = scalar_lea.vmem %s735_s19, 256  ;;  %p737_p4 = scmp.lt.s32.totalorder %s972_s27, %s735_s19 }
  0x29   : > { %v301_v15 = vrot.slane %v300_v13, 2  ;;  %p733_p2 = pneg %p732_p1  ;;  %p738_p5 = scmp.lt.s32.totalorder %s736_s11, %s730_s9 }
  0x2a   : > { %379 = vperm.xlu0 %723, %v288_v4   ;;  %396 = vperm.xlu1 %724, %v288_v4  }
  0x2b   : > { %v302_v20 = vadd.f32 %v301_v15, %v300_v13  ;;  %p739_p6 = por %p738_p5, %p737_p4 }
  0x2d   : > { %v303_v27 = vrot.slane %v302_v20, 1  ;;  %p740_p7 = pnand %p739_p6, %p733_p2 }
  0x2e   : > { %375 = vrot.lane.b32.xlu0 %v940_v5, %s827_s10  ;;  %393 = vrot.lane.b32.xlu1 %v940_v5, %s825_s21  ;;  %s482_s10 = scalar_lea.sflag [#allocation4], %s258_s26 }
  0x2f   : > { %725 = vset.pattern.permute.xlu0 %v824_v0  ;;  %v304_v35 = vadd.f32 %v303_v27, %v302_v20 }
  0x31   : > { %v365_v60 = vmul.f32 1e+08, %v304_v35  ;;  %vm364_vm4 = vcmp.ge.f32.partialorder %v304_v35, 1e-08 }
  0x33   : > { %v366_v1 = vsel %vm364_vm4, 1.0, %v365_v60 }
  0x94   : > { %v336_v12 = vpop.permute.xlu1 %335 }
  0x98   : > { %v306_v18 = vpop.permute.xlu1 %305 }
  0x9c   : > { %v341_v14 = vpop.permute.xlu0 %340 }
  0x9d   : > { %v343_v16 = vsel %vm295_vm2, %v341_v14, %v336_v12 }
  0x9e   : > { %v352_v17 = vmul.f32 %v343_v16, %v343_v16  ;;  %v344_v26 = vmul.f32 %v343_v16, %v287_v2 }
  0xa0   : > { %v353_v19 = vsel %vm297_vm1, %v352_v17, 0.0  ;;  %v345_v33 = vsel %vm297_vm1, %v344_v26, 0.0 }
  0xa1   : > { %v354_v21 = vrot.slane %v353_v19, 4  ;;  %v312_v22 = vpop.permute.xlu0 %311  ;;  %v346_v38 = vrot.slane %v345_v33, 4 }
  0xa2   : > { %v314_v23 = vsel %vm294_vm3, %v312_v22, %v306_v18 }
  0xa3   : > { %v355_v24 = vadd.f32 %v354_v21, %v353_v19  ;;  %v323_v25 = vmul.f32 %v314_v23, %v314_v23  ;;  %v315_v32 = vmul.f32 %v314_v23, %v287_v2  ;;  %v347_v45 = vadd.f32 %v346_v38, %v345_v33  ;;  %v402_v19 = vld [vmem:[%s1030_s3] sm:$0xff] }
  0xa5   : > { %v356_v28 = vrot.slane %v355_v24, 2  ;;  %v324_v29 = vsel %vm297_vm1, %v323_v25, 0.0  ;;  %v316_v40 = vsel %vm297_vm1, %v315_v32, 0.0  ;;  %v348_v50 = vrot.slane %v347_v45, 2  ;;  %v397_v56 = vpop.permute.xlu1 %396  ;;  %v380_v62 = vpop.permute.xlu0 %379 }
  0xa6   : > { %v325_v30 = vrot.slane %v324_v29, 4  ;;  %v317_v43 = vrot.slane %v316_v40, 4 }
  0xa7   : > { %v357_v31 = vadd.f32 %v356_v28, %v355_v24  ;;  %v349_v53 = vadd.f32 %v348_v50, %v347_v45 }
  0xa8   : > { %v326_v34 = vadd.f32 %v325_v30, %v324_v29  ;;  %v318_v48 = vadd.f32 %v317_v43, %v316_v40 }
  0xa9   : > { %v358_v36 = vrot.slane %v357_v31, 1  ;;  %v350_v55 = vrot.slane %v349_v53, 1  ;;  %v394_v3 = vpop.permute.xlu1 %393  ;;  %v376_v13 = vpop.permute.xlu0 %375 }
  0xaa   : > { %v327_v37 = vrot.slane %v326_v34, 2  ;;  %v319_v52 = vrot.slane %v318_v48, 2  ;;  %v399_v10 = vsel %vm295_vm2, %v397_v56, %v394_v3  ;;  %v382_v17 = vsel %vm294_vm3, %v380_v62, %v376_v13 }
  0xab   : > { %v359_v39 = vadd.f32 %v358_v36, %v357_v31  ;;  %v351_v61 = vadd.f32 %v350_v55, %v349_v53 }
  0xac   : > { %v328_v41 = vadd.f32 %v327_v37, %v326_v34  ;;  %v320_v54 = vadd.f32 %v319_v52, %v318_v48 }
  0xad   : > { %v360_v42 = vmul.f32 %v359_v39, %v304_v35 }
  0xae   : > { %v329_v44 = vrot.slane %v328_v41, 1  ;;  %v321_v59 = vrot.slane %v320_v54, 1 }
  0xaf   : > { %v361_v46 = vmax.f32 %v360_v42, 1e-16 }
  0xb0   : > { %v330_v47 = vadd.f32 %v329_v44, %v328_v41  ;;  %v322_v0 = vadd.f32 %v321_v59, %v320_v54 }
  0xb1   : > { %726 = vrsqrt.f32 %v361_v46 }
  0xb2   : > { %v331_v49 = vmul.f32 %v330_v47, %v304_v35 }
  0xb4   : > { %v332_v51 = vmax.f32 %v331_v49, 1e-16 }
  0xb6   : > { %728 = vrsqrt.f32 %v332_v51 }
  0xbe   : > { %v727_v57 = vpop.eup %726 }
  0xbf   : > { %v363_v63 = vmul.f32 %v727_v57, %v351_v61 }
  0xc1   : > { %v371_v7 = vsel %vm368_vm6, %v366_v1, %v363_v63  ;;  %v391_v9 = vsel %vm367_vm5, %v366_v1, %v363_v63 }
  0xc3   : > { %v729_v2 = vpop.eup %728 }
  0xc4   : > { %v334_v4 = vmul.f32 %v729_v2, %v322_v0 }
  0xc6   : > { %v392_v8 = vsel %vm385_vm7, %v334_v4, %v391_v9  ;;  %v388_v12 = vsel %vm385_vm7, %v334_v4, %v371_v7  ;;  %v374_v15 = vsel %vm367_vm5, %v334_v4, %v371_v7 }
  0xc7   : > { %v400_v14 = vmul.f32 %v399_v10, %v392_v8  ;;  %v389_v16 = vmul.f32 %v388_v12, %v940_v5  ;;  %v383_v18 = vmul.f32 %v382_v17, %v374_v15 }
  0xc9   : > { %634 = vmatpush3.msra.mxu0 %v400_v14 }
  0xca   : > { %635 = vmatprep.subr.mxu0 %v828_v6 }
  0xcb   : > { %636 = vmatpush3.msra.mxu0 %v389_v16 }
  0xcc   : > { %637 = vmatprep.subr.mxu0 %v828_v6 }
  0xcd   : > { %638 = vmatpush3.msra.mxu0 %v383_v18 }
  0xce   : > { %640 = vmatmul.mubr.msk.f32.vlgmr.msra.gmra.mxu0 %vm406_vm8, %v402_v19 }
 0x18e   : > { %v476_v5 = vpop.f32.mrf.mxu0 }
 0x18f   : > { %480 = vst [vmem:[%s260_s24] sm:$0xff] %v476_v5 }
 0x190   : > { %v641_v6 = vpop.f32.mrf.mxu0 }
 0x191   : > { %743 = shalt.err (!%p740_p7)
}
 0x192   : > { %s744_s12 = scalar_lea.hbm %s977_s8, 128  ;;  %s748_s26 = scalar_lea.hbm %s1031_s4, 768 }
 0x193   : > { %p745_p9 = scmp.ne.s32.totalorder %s977_s8, %s744_s12  ;;  %p749_p12 = scmp.lt.s32.totalorder %s977_s8, %s1031_s4 }
 0x194   : > { %p750_p13 = scmp.lt.s32.totalorder %s748_s26, %s744_s12 }
 0x195   : > { %p746_p10 = pnand %p745_p9, %p907_p3 }
 0x196   : > { %p751_p0 = por %p750_p13, %p749_p12 }
 0x197   : > { %p747_p11 = pneg %p746_p10 }
 0x199   : > { %p752_p1 = pnand %p751_p0, %p747_p11 }
 0x19b   : > { %755 = shalt.err (!%p752_p1)
}
 0x19c   : > { %645 = dma.vmem_to_hbm [thread:$0]  (%p907_p3), %s972_s27, 128, %s977_s8, %s482_s10  }
 0x19d PF: > { %p651_p2 = scmp.ge.s32.totalorder %s822_s22, 2  ;;  %s509_s23 = sand.u32 1, %s794_s15  }
 0x19e   : > { %s510_s24 = scalar_lea.sflag [#allocation4], %s509_s23 }
 0x19f   : > { %p648_p4 = pnand %p651_p2, %p916_p8 }
 0x1a1   : > { %p649_p5 = pneg %p648_p4 }
 0x1a3   : > { %789 = dma.done.wait (%p649_p5), %s510_s24, 128  }
 0x1a4   : > { %791 = vsyncadd (%p649_p5), %s510_s24, 4294967168  ;;  %s17_s22 = sadd.s32 1, %s822_s22   ;;  %s1040_s19 = sld [smem:[#allocation6_spill]] }
 0x1a5   : > { %p14_p6 = scmp.ge.s32.totalorder %s17_s22, 8   ;;  %s1041_s28 = sld [smem:[#allocation7_spill]] }
 0x1a6   : > { %s1042_s21 = sld [smem:[#allocation8_spill]]  ;;  %s1043_s15 = smov %s798_s16 }
 0x1a7   : > { %s1044_s16 = smov %s802_s17  ;;  %s1045_s17 = smov %s925_s7 }
 0x1a8   : > { %s1046_s18 = smov %s814_s20  ;;  %16 = sbr.rel (!%p14_p6) target bundleno = 5 (0x5), region = 77 }
 0x1ab   : > { %s1047_s20 = smov %s1041_s28 }
 0x1ad   :  { %515 = vsyncpa [#allocation4], 1 }
 0x1ae   :  { %517 = vsyncpa [#allocation4 + $0x1], 1 }

</bundles_post_ra>
